<compile_context>
chip_gen: v6e
topology: v6e:2x2x1
jax: 0.10.0
libtpu: 0.0.40
codegen_flags: <defaults>
</compile_context>

<pallas_src>
import jax
import jax.numpy as jnp
from jax.experimental import pallas as pl
from jax.experimental.pallas import tpu as pltpu


def angle_linear_kernel(x_ref, w_ref, o_ref):
    # x_ref: (TM, Kp)  w_ref: (Kp, TN)  o_ref: (TM, TN)
    x = x_ref[...]
    w = w_ref[...]

    # Row / column L2 norms with F.normalize's eps=1e-12 clamp on the denominator.
    inv_x = 1.0 / jnp.maximum(
        jnp.sqrt(jnp.sum(x * x, axis=1, keepdims=True)), 1e-12)      # (TM, 1)
    inv_w = 1.0 / jnp.maximum(
        jnp.sqrt(jnp.sum(w * w, axis=0, keepdims=True)), 1e-12)      # (1, TN)

    # Single full-K MXU matmul, then fold both normalizations into one rescale.
    cos = jnp.dot(x, w, preferred_element_type=jnp.float32)          # (TM, TN)
    cos = cos * inv_x * inv_w

    o_ref[...] = jnp.clip(cos, -1.0, 1.0).astype(o_ref.dtype)


def _round_up(x, m):
    return (x + m - 1) // m * m


def angle_simple_linear(x, weight, *, tm=256, tn=512):
    """x: (B, in_features) f32, weight: (in_features, out_features) f32.
    Returns clamp(normalize(x, rows) @ normalize(weight, cols), -1, 1)."""
    B, K = x.shape
    Kw, N = weight.shape
    assert K == Kw, "in_features mismatch"

    # Lane / sublane-dense padding (last dims -> 128, sublane dims -> 8).
    Kp = _round_up(K, 128)
    TM = min(tm, _round_up(B, 8))
    TN = min(tn, _round_up(N, 128))
    Bp = _round_up(B, TM)
    Np = _round_up(N, TN)

    xp = jnp.pad(x, ((0, Bp - B), (0, Kp - K)))
    wp = jnp.pad(weight, ((0, Kp - K), (0, Np - N)))

    grid = (Bp // TM, Np // TN)

    out = pl.pallas_call(
        angle_linear_kernel,
        out_shape=jax.ShapeDtypeStruct((Bp, Np), jnp.float32),
        grid_spec=pltpu.PrefetchScalarGridSpec(
            num_scalar_prefetch=0,
            grid=grid,
            in_specs=[
                pl.BlockSpec((TM, Kp), lambda i, j: (i, 0)),   # x row-tile, full K
                pl.BlockSpec((Kp, TN), lambda i, j: (0, j)),   # W col-tile, full K
            ],
            out_specs=pl.BlockSpec((TM, TN), lambda i, j: (i, j)),
        ),
        compiler_params=pltpu.CompilerParams(
            dimension_semantics=("parallel", "parallel")),
    )(xp, wp)

    return out[:B, :N]


def reference(x, weight, eps=1e-12):
    """Pure-JAX reference of the same forward pass (for verification)."""
    xn = x / jnp.maximum(jnp.linalg.norm(x, axis=1, keepdims=True), eps)
    wn = weight / jnp.maximum(jnp.linalg.norm(weight, axis=0, keepdims=True), eps)
    return jnp.clip(xn @ wn, -1.0, 1.0)


def init_angle_weight(key, in_features, out_features):
    """Mimics: weight.uniform_(-1, 1).renorm_(2, 1, 1e-5).mul_(1e5)
    (each column renormalized to L2 norm <= 1e-5, then scaled by 1e5)."""
    w = jax.random.uniform(key, (in_features, out_features), jnp.float32, -1.0, 1.0)
    col_norm = jnp.linalg.norm(w, axis=0, keepdims=True)
    factor = jnp.where(col_norm > 1e-5, 1e-5 / col_norm, 1.0)
    return w * factor * 1e5


if __name__ == "__main__":
    # Small shapes consistent with the module (a cosine classification head).
    B, in_features, out_features = 4, 32, 10

    key = jax.random.PRNGKey(0)
    kx, kw = jax.random.split(key)
    x = jax.random.normal(kx, (B, in_features), jnp.float32)
    w = init_angle_weight(kw, in_features, out_features)

    out = angle_simple_linear(x, w)
    out = jax.block_until_ready(out)

    ref = reference(x, w)
    assert out.shape == (B, out_features)
    assert bool(jnp.all(out <= 1.0)) and bool(jnp.all(out >= -1.0))
    assert jnp.allclose(out, ref, atol=1e-4, rtol=1e-4), "mismatch vs reference"

    print("KERNEL_OK")
</pallas_src>

<mosaic_0001>
module attributes {stable_mosaic.version = 11 : i64} {
  func.func @angle_linear_kernel(%arg0: i32, %arg1: i32, %arg2: memref<8x128xf32, #tpu.memory_space<vmem>>, %arg3: memref<128x128xf32, #tpu.memory_space<vmem>>, %arg4: memref<8x128xf32, #tpu.memory_space<vmem>>) attributes {dimension_semantics = [#tpu.dimension_semantics<parallel>, #tpu.dimension_semantics<parallel>], iteration_bounds = array<i64: 1, 1>, scalar_prefetch = 0 : i64, scratch_operands = 0 : i64, tpu.core_type = #tpu.core_type<tc>, window_params = [{transform_indices = @transform_0, window_bounds = array<i64: 8, 128>}, {transform_indices = @transform_1, window_bounds = array<i64: 128, 128>}, {transform_indices = @transform_2, window_bounds = array<i64: 8, 128>}]} {
    %c0 = arith.constant 0 : index
    %c0_0 = arith.constant 0 : index
    %0 = vector.load %arg2[%c0, %c0_0] : memref<8x128xf32, #tpu.memory_space<vmem>>, vector<8x128xf32>
    %c0_1 = arith.constant 0 : index
    %c0_2 = arith.constant 0 : index
    %1 = vector.load %arg3[%c0_1, %c0_2] : memref<128x128xf32, #tpu.memory_space<vmem>>, vector<128x128xf32>
    %2 = arith.mulf %0, %0 : vector<8x128xf32>
    %cst = arith.constant dense<0.000000e+00> : vector<8xf32>
    %3 = vector.multi_reduction <add>, %2, %cst [1] : vector<8x128xf32> to vector<8xf32>
    %4 = vector.shape_cast %3 : vector<8xf32> to vector<8x1xf32>
    %5 = math.sqrt %4 : vector<8x1xf32>
    %cst_3 = arith.constant 9.99999996E-13 : f32
    %6 = vector.broadcast %cst_3 : f32 to vector<8x1xf32>
    %7 = arith.maximumf %5, %6 : vector<8x1xf32>
    %cst_4 = arith.constant 1.000000e+00 : f32
    %8 = vector.broadcast %cst_4 : f32 to vector<8x1xf32>
    %9 = arith.divf %8, %7 : vector<8x1xf32>
    %10 = arith.mulf %1, %1 : vector<128x128xf32>
    %cst_5 = arith.constant dense<0.000000e+00> : vector<128xf32>
    %11 = vector.multi_reduction <add>, %10, %cst_5 [0] : vector<128x128xf32> to vector<128xf32>
    %12 = vector.shape_cast %11 : vector<128xf32> to vector<1x128xf32>
    %13 = math.sqrt %12 : vector<1x128xf32>
    %cst_6 = arith.constant 9.99999996E-13 : f32
    %14 = vector.broadcast %cst_6 : f32 to vector<1x128xf32>
    %15 = arith.maximumf %13, %14 : vector<1x128xf32>
    %cst_7 = arith.constant 1.000000e+00 : f32
    %16 = vector.broadcast %cst_7 : f32 to vector<1x128xf32>
    %17 = arith.divf %16, %15 : vector<1x128xf32>
    %cst_8 = arith.constant dense<0.000000e+00> : vector<8x128xf32>
    %18 = tpu.matmul %0, %1, %cst_8 {dimension_numbers = #tpu.dot_dimension_numbers<[1], [0], [0], [1], [0, 0, 1, 1], [], []>} : vector<8x128xf32>, vector<128x128xf32>, vector<8x128xf32> -> vector<8x128xf32>
    %19 = vector.broadcast %9 : vector<8x1xf32> to vector<8x128xf32>
    %20 = arith.mulf %18, %19 : vector<8x128xf32>
    %21 = vector.broadcast %17 : vector<1x128xf32> to vector<8x128xf32>
    %22 = arith.mulf %20, %21 : vector<8x128xf32>
    %cst_9 = arith.constant -1.000000e+00 : f32
    %cst_10 = arith.constant 1.000000e+00 : f32
    %23 = vector.broadcast %cst_9 : f32 to vector<8x128xf32>
    %24 = arith.maximumf %23, %22 : vector<8x128xf32>
    %25 = vector.broadcast %cst_10 : f32 to vector<8x128xf32>
    %26 = arith.minimumf %25, %24 : vector<8x128xf32>
    %c0_11 = arith.constant 0 : index
    %c0_12 = arith.constant 0 : index
    %27 = vector.load %arg4[%c0_11, %c0_12] : memref<8x128xf32, #tpu.memory_space<vmem>>, vector<8x128xf32>
    tpu.vector_store %arg4[%c0_11, %c0_12], %26 {strides = array<i32>} : memref<8x128xf32, #tpu.memory_space<vmem>>, vector<8x128xf32>,
    return
  }
  func.func @transform_0(%arg0: i32, %arg1: i32) -> (i32, i32) {
    %c0_i32 = arith.constant 0 : i32
    %c0_i32_0 = arith.constant 0 : i32
    return %arg0, %c0_i32 : i32, i32
  }
  func.func @transform_1(%arg0: i32, %arg1: i32) -> (i32, i32) {
    %c0_i32 = arith.constant 0 : i32
    %c0_i32_0 = arith.constant 0 : i32
    return %c0_i32, %arg1 : i32, i32
  }
  func.func @transform_2(%arg0: i32, %arg1: i32) -> (i32, i32) {
    %c0_i32 = arith.constant 0 : i32
    return %arg0, %arg1 : i32, i32
  }
}

</mosaic_0001>

<bundles_post_ra>
// kernel: tpu_custom_call.1
= control target key start
LH: loop header
LB: loop body
LE: loop exit
PB: predicated region body
PF: predicated region fallthrough
CT: control target
= control target key end

     0   :  { %7 = vsyncpa [#allocation3], 0  ;;  %s418_s0 = inlined_call_operand.hbm [shape: f32[8,128], index: 0, kind: input, shape index: {}]   ;;  %s419_s1 = inlined_call_operand.hbm [shape: f32[128,128], index: 1, kind: input, shape index: {}]   ;;  %s420_s2 = inlined_call_operand.hbm [shape: f32[8,128], index: 2, kind: output, shape index: {}]  }
   0x1   :  { %8 = vsyncpa [#allocation6], 0 }
   0x2   :  { %9 = vsyncpa [#allocation4], 0  ;;  %s340_s9 = smov [#allocation2]   ;;  %s341_s11 = smov [#allocation5]  }
   0x3   :  { %s16_s10 = sshll.u32 %s340_s9, 4  ;;  %s25_s12 = sshll.u32 %s341_s11, 4  ;;  %s17_s10 = int_to_ptr.vmem [resolvable:$true] %s16_s10  ;;  %s26_s12 = int_to_ptr.vmem [resolvable:$true] %s25_s12 }
   0x4   :  { %s282_s13 = scalar_lea.vmem %s17_s10, 128  ;;  %p287_p1 = scmp.lt.s32.totalorder %s17_s10, %s17_s10 }
   0x5   :  { %p283_p0 = scmp.ne.s32.totalorder %s17_s10, %s282_s13  ;;  %p288_p2 = scmp.lt.s32.totalorder %s282_s13, %s282_s13 }
   0x7   :  { %p289_p3 = por %p288_p2, %p287_p1 }
   0x9   :  { %p290_p4 = pnand %p289_p3, %p283_p0 }
   0xb   :  { %293 = shalt.err (!%p290_p4)
}
   0xc   :  { %19 = dma.hbm_to_vmem [thread:$0]  %s418_s0, 128, %s17_s10, [#allocation3]  }
   0xd   :  { %s302_s16 = scalar_lea.vmem %s26_s12, 2048  ;;  %p307_p6 = scmp.lt.s32.totalorder %s26_s12, %s26_s12 }
   0xe   :  { %p303_p5 = scmp.ne.s32.totalorder %s26_s12, %s302_s16  ;;  %p308_p7 = scmp.lt.s32.totalorder %s302_s16, %s302_s16 }
  0x10   :  { %p309_p8 = por %p308_p7, %p307_p6 }
  0x12   :  { %p310_p9 = pnand %p309_p8, %p303_p5 }
  0x14   :  { %313 = shalt.err (!%p310_p9)
}
  0x15   :  { %s342_s17 = smov 128   ;;  %s343_s18 = smov 8  }
  0x16   :  { %31 = dma.hbm_to_vmem [thread:$0]  %s419_s1, 2048, %s26_s12, [#allocation6], %s342_s17, %s342_s17, %s343_s18  }
  0x17   :  { %334 = dma.done.wait [#allocation3], 128  }
  0x18   :  { %335 = vsyncadd [#allocation3], 4294967168 }
  0x19   :  { %336 = dma.done.wait [#allocation6], 2048  }
  0x1a   :  { %337 = vsyncadd [#allocation6], 4294965248  ;;  %v344_v0 = vmov 0.0   ;;  %vm345_vm0 = vmmov 0   ;;  %v370_v1 = vld [vmem:[#allocation5 + $0x78] sm:$0xff]  ;;  %v372_v2 = vld [vmem:[#allocation5 + $0x70] sm:$0xff] }
  0x1b   :  { %224 = vmatprep.subr.mxu0 %v344_v0  ;;  %256 = vmatprep.mubr.msk.f32.mxu0 %vm345_vm0, %v344_v0  ;;  %v376_v3 = vld [vmem:[#allocation5 + $0x68] sm:$0xff]  ;;  %v51_v4 = vld [vmem:[#allocation5 + $0x60] sm:$0xff]  ;;  %v41_v7 = vld [vmem:[#allocation5 + $0x10] sm:$0xff]  ;;  %v82_v44 = vmul.f32 %v372_v2, %v372_v2  ;;  %v83_v46 = vmul.f32 %v370_v1, %v370_v1  ;;  %s346_s0 = smov [#allocation7]  }
  0x1c   :  { %225 = vmatpush3.msra.mxu0 %v370_v1  ;;  %v380_v5 = vld [vmem:[#allocation5] sm:$0xff]  ;;  %v382_v6 = vld [vmem:[#allocation5 + $0x8] sm:$0xff]  ;;  %v389_v10 = vld [vmem:[#allocation2] sm:$0xff]  ;;  %v70_v13 = vmul.f32 %v41_v7, %v41_v7  ;;  %v80_v40 = vmul.f32 %v51_v4, %v51_v4  ;;  %v81_v42 = vmul.f32 %v376_v3, %v376_v3  ;;  %s196_s1 = sshll.u32 %s346_s0, 4  ;;  %s197_s1 = int_to_ptr.vmem [resolvable:$true] %s196_s1 }
  0x1d   :  { %226 = vmatprep.subr.mxu0 %v344_v0  ;;  %v68_v8 = vmul.f32 %v380_v5, %v380_v5  ;;  %v69_v9 = vmul.f32 %v382_v6, %v382_v6  ;;  %v50_v11 = vld [vmem:[#allocation5 + $0x58] sm:$0xff]  ;;  %v55_v14 = vmul.f32 %v389_v10, %v389_v10  ;;  %v49_v17 = vld [vmem:[#allocation5 + $0x50] sm:$0xff]  ;;  %v43_v18 = vld [vmem:[#allocation5 + $0x20] sm:$0xff]  ;;  %s314_s21 = scalar_lea.vmem %s197_s1, 128  ;;  %p319_p11 = scmp.lt.s32.totalorder %s197_s1, %s197_s1 }
  0x1e   :  { %227 = vmatpush3.msra.mxu0 %v372_v2  ;;  %v42_v12 = vld [vmem:[#allocation5 + $0x18] sm:$0xff]  ;;  %v72_v19 = vmul.f32 %v43_v18, %v43_v18  ;;  %v48_v21 = vld [vmem:[#allocation5 + $0x48] sm:$0xff]  ;;  %v47_v25 = vld [vmem:[#allocation5 + $0x40] sm:$0xff]  ;;  %v78_v36 = vmul.f32 %v49_v17, %v49_v17  ;;  %v79_v38 = vmul.f32 %v50_v11, %v50_v11  ;;  %p315_p10 = scmp.ne.s32.totalorder %s197_s1, %s314_s21  ;;  %p320_p12 = scmp.lt.s32.totalorder %s314_s21, %s314_s21 }
  0x1f   :  { %228 = vmatprep.subr.mxu0 %v344_v0  ;;  %v71_v15 = vmul.f32 %v42_v12, %v42_v12  ;;  %v84_v16 = vadd.f32 %v69_v9, %v68_v8  ;;  %56 = vadd.xlane.f32.xlu0 %v55_v14  ;;  %v44_v22 = vld [vmem:[#allocation5 + $0x28] sm:$0xff]  ;;  %v45_v26 = vld [vmem:[#allocation5 + $0x30] sm:$0xff]  ;;  %v46_v29 = vld [vmem:[#allocation5 + $0x38] sm:$0xff]  ;;  %v76_v32 = vmul.f32 %v47_v25, %v47_v25 }
  0x20   :  { %229 = vmatpush3.msra.mxu0 %v376_v3  ;;  %v73_v23 = vmul.f32 %v44_v22, %v44_v22  ;;  %v74_v27 = vmul.f32 %v45_v26, %v45_v26  ;;  %v75_v30 = vmul.f32 %v46_v29, %v46_v29  ;;  %v77_v34 = vmul.f32 %v48_v21, %v48_v21  ;;  %p321_p13 = por %p320_p12, %p319_p11 }
  0x21   :  { %230 = vmatprep.subr.mxu0 %v344_v0  ;;  %v85_v20 = vadd.f32 %v84_v16, %v70_v13 }
  0x22   :  { %231 = vmatpush3.msra.mxu0 %v51_v4  ;;  %p322_p0 = pnand %p321_p13, %p315_p10 }
  0x23   :  { %232 = vmatprep.subr.mxu0 %v344_v0  ;;  %v86_v24 = vadd.f32 %v85_v20, %v71_v15 }
  0x24   :  { %233 = vmatpush3.msra.mxu0 %v50_v11 }
  0x25   :  { %234 = vmatprep.subr.mxu0 %v344_v0  ;;  %v87_v28 = vadd.f32 %v86_v24, %v72_v19 }
  0x26   :  { %235 = vmatpush3.msra.mxu0 %v49_v17 }
  0x27   :  { %236 = vmatprep.subr.mxu0 %v344_v0  ;;  %v88_v31 = vadd.f32 %v87_v28, %v73_v23 }
  0x28   :  { %237 = vmatpush3.msra.mxu0 %v48_v21 }
  0x29   :  { %238 = vmatprep.subr.mxu0 %v344_v0  ;;  %v89_v33 = vadd.f32 %v88_v31, %v74_v27 }
  0x2a   :  { %239 = vmatpush3.msra.mxu0 %v47_v25 }
  0x2b   :  { %240 = vmatprep.subr.mxu0 %v344_v0  ;;  %v90_v35 = vadd.f32 %v89_v33, %v75_v30 }
  0x2c   :  { %241 = vmatpush3.msra.mxu0 %v46_v29 }
  0x2d   :  { %242 = vmatprep.subr.mxu0 %v344_v0  ;;  %v91_v37 = vadd.f32 %v90_v35, %v76_v32 }
  0x2e   :  { %243 = vmatpush3.msra.mxu0 %v45_v26 }
  0x2f   :  { %244 = vmatprep.subr.mxu0 %v344_v0  ;;  %v92_v39 = vadd.f32 %v91_v37, %v77_v34 }
  0x30   :  { %245 = vmatpush3.msra.mxu0 %v44_v22 }
  0x31   :  { %246 = vmatprep.subr.mxu0 %v344_v0  ;;  %v93_v41 = vadd.f32 %v92_v39, %v78_v36 }
  0x32   :  { %247 = vmatpush3.msra.mxu0 %v43_v18 }
  0x33   :  { %248 = vmatprep.subr.mxu0 %v344_v0  ;;  %v94_v43 = vadd.f32 %v93_v41, %v79_v38 }
  0x34   :  { %249 = vmatpush3.msra.mxu0 %v42_v12 }
  0x35   :  { %250 = vmatprep.subr.mxu0 %v344_v0  ;;  %v95_v45 = vadd.f32 %v94_v43, %v80_v40 }
  0x36   :  { %251 = vmatpush3.msra.mxu0 %v41_v7 }
  0x37   :  { %252 = vmatprep.subr.mxu0 %v344_v0  ;;  %v96_v47 = vadd.f32 %v95_v45, %v81_v42 }
  0x38   :  { %253 = vmatpush3.msra.mxu0 %v382_v6 }
  0x39   :  { %254 = vmatprep.subr.mxu0 %v344_v0  ;;  %v97_v48 = vadd.f32 %v96_v47, %v82_v44 }
  0x3a   :  { %255 = vmatpush3.msra.mxu0 %v380_v5 }
  0x3b   :  { %257 = vmatmul.mubr.f32.vlgmr.msra.gmra.mxu0 %v389_v10  ;;  %v98_v49 = vadd.f32 %v97_v48, %v83_v46 }
  0x3d   :  { %v99_v50 = vrot.slane %v98_v49, 4 }
  0x3f   :  { %v100_v51 = vadd.f32 %v99_v50, %v98_v49 }
  0x41   :  { %v101_v52 = vrot.slane %v100_v51, 2 }
  0x43   :  { %v102_v53 = vadd.f32 %v101_v52, %v100_v51 }
  0x45   :  { %v103_v54 = vrot.slane %v102_v53, 1 }
  0x47   :  { %v104_v55 = vadd.f32 %v103_v54, %v102_v53 }
  0x49   :  { %266 = vrsqrt.f32 %v104_v55  ;;  %vm107_vm1 = vcmp.eq.f32.partialorder %v104_v55, inf  ;;  %v110_v61 = vand.u32 2147483648, %v104_v55  ;;  %vm109_vm3 = vcmp.eq.f32.partialorder %v104_v55, 0.0 }
  0x56   :  { %v267_v57 = vpop.eup %266 }
  0x57   :  { %v106_v59 = vmul.f32 %v267_v57, %v104_v55 }
  0x59   :  { %v108_v63 = vsel %vm107_vm1, %v104_v55, %v106_v59 }
  0x5a   :  { %v111_v1 = vsel %vm109_vm3, %v110_v61, %v108_v63 }
  0x5b   :  { %v112_v3 = vmax.f32 %v111_v1, 1e-12 }
  0xa8   :  { %v57_v56 = vpop.xlane.xlu0 %56 }
  0xa9   :  { %268 = vrsqrt.f32 %v57_v56  ;;  %vm60_vm2 = vcmp.eq.f32.partialorder %v57_v56, inf  ;;  %v63_v62 = vand.u32 2147483648, %v57_v56  ;;  %vm62_vm4 = vcmp.eq.f32.partialorder %v57_v56, 0.0 }
  0xaa   :  { %270 = vrcp.f32 %v112_v3 }
  0xb6   :  { %v269_v58 = vpop.eup %268 }
  0xb7   :  { %v59_v60 = vmul.f32 %v269_v58, %v57_v56  ;;  %v271_v5 = vpop.eup %270 }
  0xb9   :  { %v61_v0 = vsel %vm60_vm2, %v57_v56, %v59_v60 }
  0xba   :  { %v64_v2 = vsel %vm62_vm4, %v63_v62, %v61_v0 }
  0xbb   :  { %v65_v4 = vmax.f32 %v64_v2, 1e-12 }
  0xbd   :  { %272 = vrcp.f32 %v65_v4 }
  0xca   :  { %v273_v6 = vpop.eup %272 }
  0xfb   :  { %v181_v7 = vpop.f32.mrf.mxu0 }
  0xfc   :  { %v185_v8 = vmul.f32 %v273_v6, %v181_v7 }
  0xfd   :  { %v258_v9 = vpop.f32.mrf.mxu0 }
  0xfe   :  { %v186_v10 = vmul.f32 %v271_v5, %v185_v8 }
 0x100   :  { %v206_v11 = vclamps-f32 %v186_v10, 1.0 }
 0x102   :  { %189 = vst [vmem:[#allocation7] sm:$0xff] %v206_v11 }
 0x103   :  { %325 = shalt.err (!%p322_p0)
}
 0x104   :  { %199 = dma.vmem_to_hbm [thread:$0]  %s197_s1, 128, %s420_s2, [#allocation4]  }
 0x105   :  { %338 = dma.done.wait [#allocation4], 128  }
 0x106   :  { %339 = vsyncadd [#allocation4], 4294967168 }
 0x107   :  { %203 = vsyncpa [#allocation3], 1 }
 0x108   :  { %204 = vsyncpa [#allocation6], 1 }
 0x109   :  { %205 = vsyncpa [#allocation4], 1 }

</bundles_post_ra>
